<compile_context>
chip_gen: v7x
topology: tpu7x:2x2x1
jax: 0.10.0
libtpu: 0.0.40
codegen_flags: <defaults>
</compile_context>

<pallas_src>
import functools

import jax
import jax.numpy as jnp
from jax.experimental import pallas as pl
from jax.experimental.pallas import tpu as pltpu


def _contrastive_loss_kernel(o1_ref, o2_ref, label_ref, out_ref, acc_ref, *,
                             margin, batch_size, tile_rows, tiles_per_group,
                             needs_mask):
    g = pl.program_id(0)          # group axis ("parallel": TC-shardable on v7x)
    t = pl.program_id(1)          # tiles within a group ("arbitrary": serial)

    @pl.when(t == 0)
    def _():
        acc_ref[0] = jnp.float32(0.0)

    # DMA'd in native dtype; compute in f32.
    o1 = o1_ref[...].astype(jnp.float32)        # (TB, D)
    o2 = o2_ref[...].astype(jnp.float32)        # (TB, D)
    lbl = label_ref[...].astype(jnp.float32)    # (TB, 1)

    diff = o1 - o2
    # torch.sum((o1 - o2) ** 2, dim=1, keepdim=True)  -- XLU lane-reduce,
    # hidden under the HBM DMA; deliberately NOT routed through the MXU.
    sq_dist = jnp.sum(diff * diff, axis=1, keepdims=True)       # (TB, 1)
    euclid = jnp.sqrt(sq_dist)                                   # (TB, 1)

    piecable_loss = lbl * sq_dist                                # label * d^2
    clamped = jnp.maximum(margin - euclid, 0.0)
    inpiecable_loss = (1.0 - lbl) * (clamped * clamped)
    per_row = piecable_loss + inpiecable_loss                    # (TB, 1)

    if needs_mask:
        # Masks both the ragged rows of the last real tile and any whole
        # padding tiles introduced by an uneven group split (their logical
        # rows are all >= batch_size).
        logical_tile = g * tiles_per_group + t
        row = logical_tile * tile_rows + jax.lax.broadcasted_iota(
            jnp.int32, (tile_rows, 1), 0)
        per_row = jnp.where(row < batch_size, per_row, 0.0)

    acc_ref[0] += jnp.sum(per_row)

    @pl.when(t == tiles_per_group - 1)
    def _():
        # Lane-dense (8,128) partial-sum block per group (unmasked vst).
        out_ref[...] = jnp.full((1, 8, 128), acc_ref[0], dtype=jnp.float32)


def _choose_tile_rows(B, D, feat_dtype, label_dtype):
    """Largest batch tile whose double-buffered VMEM footprint fits the budget."""
    itemsize = jnp.dtype(feat_dtype).itemsize
    lbl_itemsize = jnp.dtype(label_dtype).itemsize
    d_pad = ((D + 127) // 128) * 128               # lane padding of the feature dim
    sub_mult = max(8, 32 // itemsize)              # 8 f32 / 16 bf16 / 32 int8

    # ~24 MiB of buffered data per pipeline step; vmem_limit_bytes is set to
    # 48 MiB, below physical VMEM on every generation (64 MiB/TC on v7x).
    budget_bytes = 24 * 1024 * 1024
    per_row_bytes = (
        2 * 2 * d_pad * itemsize        # o1 + o2, double-buffered, lane-padded
        + 2 * 128 * max(lbl_itemsize, 4)  # (tb,1) label block pads to 128 lanes
        + 3 * d_pad * 4                 # in-kernel f32 temporaries (upcasts, diff)
    )
    tb = budget_bytes // max(per_row_bytes, 1)
    tb = int((tb // sub_mult) * sub_mult)
    if tb <= 0:
        tb = sub_mult
    if tb >= B:
        return B                        # single full-batch tile (full dims legal)
    return tb


def contrastive_loss(output1, output2, label, margin=1.0, tile_rows=None,
                     num_groups=None):
    """JAX/Pallas equivalent of ContrastiveLoss.forward (returns scalar mean loss)."""
    B, D = output1.shape
    assert output2.shape == (B, D)
    assert label.shape == (B, 1)

    itemsize = jnp.dtype(output1.dtype).itemsize
    tb = tile_rows if tile_rows is not None else _choose_tile_rows(
        B, D, output1.dtype, label.dtype)
    n_blocks = pl.cdiv(B, tb)

    if num_groups is None:
        # Two groups let the outer "parallel" axis shard across the two
        # TensorCores on v7x (no-op on 1-TC v5e/v6e).  Skip the split when it
        # would waste a whole padded tile on a small problem.
        num_groups = 2 if (n_blocks >= 2 and (n_blocks % 2 == 0 or n_blocks >= 8)) else 1
    num_groups = max(1, min(num_groups, n_blocks))

    tiles_per_group = pl.cdiv(n_blocks, num_groups)
    clamp_needed = num_groups * tiles_per_group > n_blocks
    needs_mask = (num_groups * tiles_per_group * tb != B)

    def batch_block(g, t):
        b = g * tiles_per_group + t
        if clamp_needed:
            b = jnp.minimum(b, n_blocks - 1)   # padding tiles re-read last block
        return (b, 0)

    kernel = functools.partial(
        _contrastive_loss_kernel,
        margin=float(margin), batch_size=B, tile_rows=tb,
        tiles_per_group=tiles_per_group, needs_mask=needs_mask)

    cost = pl.CostEstimate(
        flops=3 * B * D + 6 * B,
        transcendentals=B,
        bytes_accessed=2 * B * D * itemsize
        + B * jnp.dtype(label.dtype).itemsize
        + num_groups * 8 * 128 * 4,
    )

    partials = pl.pallas_call(
        kernel,
        out_shape=jax.ShapeDtypeStruct((num_groups, 8, 128), jnp.float32),
        grid=(num_groups, tiles_per_group),
        in_specs=[
            pl.BlockSpec((tb, D), batch_block),
            pl.BlockSpec((tb, D), batch_block),
            pl.BlockSpec((tb, 1), batch_block),
        ],
        out_specs=pl.BlockSpec((1, 8, 128), lambda g, t: (g, 0, 0)),
        scratch_shapes=[pltpu.SMEM((1,), jnp.float32)],
        compiler_params=pltpu.CompilerParams(
            dimension_semantics=("parallel", "arbitrary"),
            vmem_limit_bytes=48 * 1024 * 1024),
        cost_estimate=cost,
    )(output1, output2, label)

    # Final cross-group reduction + mean in the wrapper (2 elements at most).
    return jnp.sum(partials[:, 0, 0]) / jnp.float32(B)


def _reference_contrastive_loss(output1, output2, label, margin=1.0):
    # Pure-JAX reference mirroring the PyTorch module, for verification.
    o1 = output1.astype(jnp.float32)
    o2 = output2.astype(jnp.float32)
    lbl = label.astype(jnp.float32)
    d = jnp.sqrt(jnp.sum((o1 - o2) ** 2, axis=1, keepdims=True))
    pos = lbl * d ** 2
    neg = (1.0 - lbl) * jnp.maximum(margin - d, 0.0) ** 2
    return jnp.mean(pos + neg)


if __name__ == "__main__":
    key = jax.random.PRNGKey(0)

    # Test 1: small batch, single full-batch tile (like the module's usage).
    k1, k2, k3 = jax.random.split(key, 3)
    B, D = 2, 32
    o1 = jax.random.normal(k1, (B, D), dtype=jnp.float32)
    o2 = jax.random.normal(k2, (B, D), dtype=jnp.float32)
    lbl = jax.random.bernoulli(k3, 0.5, (B, 1)).astype(jnp.float32)

    loss = jax.block_until_ready(contrastive_loss(o1, o2, lbl, margin=1.0))
    ref = _reference_contrastive_loss(o1, o2, lbl, margin=1.0)
    assert jnp.allclose(loss, ref, rtol=1e-5, atol=1e-6), (loss, ref)

    # Test 2: batch not a multiple of the tile -> tiled grid, SMEM accumulator,
    # ragged-last-tile masking (single group).
    k4, k5, k6 = jax.random.split(jax.random.PRNGKey(1), 3)
    B2, D2 = 20, 32
    o1b = jax.random.normal(k4, (B2, D2), dtype=jnp.float32)
    o2b = jax.random.normal(k5, (B2, D2), dtype=jnp.float32)
    lblb = jax.random.bernoulli(k6, 0.5, (B2, 1)).astype(jnp.float32)

    loss2 = jax.block_until_ready(
        contrastive_loss(o1b, o2b, lblb, margin=1.0, tile_rows=8))
    ref2 = _reference_contrastive_loss(o1b, o2b, lblb, margin=1.0)
    assert jnp.allclose(loss2, ref2, rtol=1e-5, atol=1e-6), (loss2, ref2)

    # Test 3: force the 2-group ("parallel") path with an uneven split ->
    # exercises the clamped index_map, per-group partial sums and padding-tile
    # masking (megacore path on v7x; serial elsewhere).
    loss3 = jax.block_until_ready(
        contrastive_loss(o1b, o2b, lblb, margin=1.0, tile_rows=8, num_groups=2))
    assert jnp.allclose(loss3, ref2, rtol=1e-5, atol=1e-6), (loss3, ref2)

    # Test 4: even 2-group split (no masking anywhere).
    k7, k8, k9 = jax.random.split(jax.random.PRNGKey(2), 3)
    B4, D4 = 32, 64
    o1c = jax.random.normal(k7, (B4, D4), dtype=jnp.float32)
    o2c = jax.random.normal(k8, (B4, D4), dtype=jnp.float32)
    lblc = jax.random.bernoulli(k9, 0.5, (B4, 1)).astype(jnp.float32)

    loss4 = jax.block_until_ready(
        contrastive_loss(o1c, o2c, lblc, margin=1.0, tile_rows=8))
    ref4 = _reference_contrastive_loss(o1c, o2c, lblc, margin=1.0)
    assert jnp.allclose(loss4, ref4, rtol=1e-5, atol=1e-6), (loss4, ref4)

    print("KERNEL_OK")
</pallas_src>

<mosaic_0001>
module attributes {stable_mosaic.version = 11 : i64} {
  func.func @_contrastive_loss_kernel(%arg0: i32, %arg1: i32, %arg2: memref<2x32xf32, #tpu.memory_space<vmem>>, %arg3: memref<2x32xf32, #tpu.memory_space<vmem>>, %arg4: memref<2x1xf32, #tpu.memory_space<vmem>>, %arg5: memref<1x8x128xf32, #tpu.memory_space<vmem>>, %arg6: memref<1xf32, #tpu.memory_space<smem>>) attributes {dimension_semantics = [#tpu.dimension_semantics<parallel>, #tpu.dimension_semantics<arbitrary>], iteration_bounds = array<i64: 1, 1>, scalar_prefetch = 0 : i64, scratch_operands = 1 : i64, tpu.core_type = #tpu.core_type<tc>, window_params = [{transform_indices = @transform_0, window_bounds = array<i64: 2, 32>}, {transform_indices = @transform_1, window_bounds = array<i64: 2, 32>}, {transform_indices = @transform_2, window_bounds = array<i64: 2, 1>}, {transform_indices = @transform_3, window_bounds = array<i64: 1, 8, 128>}]} {
    %c0_i32 = arith.constant 0 : i32
    %0 = arith.cmpi eq, %arg1, %c0_i32 : i32
    %1 = arith.extui %0 : i1 to i32
    %c0_i32_0 = arith.constant 0 : i32
    %2 = arith.cmpi ne, %1, %c0_i32_0 : i32
    scf.if %2 {
      %cst_14 = arith.constant 0.000000e+00 : f32
      %c0_15 = arith.constant 0 : index
      %31 = memref.load %arg6[%c0_15] : memref<1xf32, #tpu.memory_space<smem>>
      memref.store %cst_14, %arg6[%c0_15] : memref<1xf32, #tpu.memory_space<smem>>
    } else {
    }
    %c0 = arith.constant 0 : index
    %c0_1 = arith.constant 0 : index
    %3 = vector.load %arg2[%c0, %c0_1] : memref<2x32xf32, #tpu.memory_space<vmem>>, vector<2x32xf32>
    %c0_2 = arith.constant 0 : index
    %c0_3 = arith.constant 0 : index
    %4 = vector.load %arg3[%c0_2, %c0_3] : memref<2x32xf32, #tpu.memory_space<vmem>>, vector<2x32xf32>
    %c0_4 = arith.constant 0 : index
    %c0_5 = arith.constant 0 : index
    %5 = vector.load %arg4[%c0_4, %c0_5] : memref<2x1xf32, #tpu.memory_space<vmem>>, vector<2x1xf32>
    %6 = arith.subf %3, %4 : vector<2x32xf32>
    %7 = arith.mulf %6, %6 : vector<2x32xf32>
    %cst = arith.constant dense<0.000000e+00> : vector<2xf32>
    %8 = vector.multi_reduction <add>, %7, %cst [1] : vector<2x32xf32> to vector<2xf32>
    %9 = vector.shape_cast %8 : vector<2xf32> to vector<2x1xf32>
    %10 = math.sqrt %9 : vector<2x1xf32>
    %11 = arith.mulf %5, %9 : vector<2x1xf32>
    %cst_6 = arith.constant 1.000000e+00 : f32
    %12 = vector.broadcast %cst_6 : f32 to vector<2x1xf32>
    %13 = arith.subf %12, %10 : vector<2x1xf32>
    %cst_7 = arith.constant 0.000000e+00 : f32
    %14 = vector.broadcast %cst_7 : f32 to vector<2x1xf32>
    %15 = arith.maximumf %13, %14 : vector<2x1xf32>
    %cst_8 = arith.constant 1.000000e+00 : f32
    %16 = vector.broadcast %cst_8 : f32 to vector<2x1xf32>
    %17 = arith.subf %16, %5 : vector<2x1xf32>
    %18 = arith.mulf %15, %15 : vector<2x1xf32>
    %19 = arith.mulf %17, %18 : vector<2x1xf32>
    %20 = arith.addf %11, %19 : vector<2x1xf32>
    %c0_9 = arith.constant 0 : index
    %21 = memref.load %arg6[%c0_9] : memref<1xf32, #tpu.memory_space<smem>>
    %22 = vector.shape_cast %20 : vector<2x1xf32> to vector<1x2x1xf32>
    %cst_10 = arith.constant dense<0.000000e+00> : vector<1xf32>
    %23 = vector.multi_reduction <add>, %22, %cst_10 [1, 2] : vector<1x2x1xf32> to vector<1xf32>
    %24 = vector.shape_cast %23 : vector<1xf32> to vector<1x1x1xf32>
    %25 = vector.extract %24[0, 0, 0] : f32 from vector<1x1x1xf32>
    %26 = arith.addf %21, %25 : f32
    %c0_11 = arith.constant 0 : index
    %27 = memref.load %arg6[%c0_11] : memref<1xf32, #tpu.memory_space<smem>>
    memref.store %26, %arg6[%c0_11] : memref<1xf32, #tpu.memory_space<smem>>
    %c0_i32_12 = arith.constant 0 : i32
    %28 = arith.cmpi eq, %arg1, %c0_i32_12 : i32
    %29 = arith.extui %28 : i1 to i32
    %c0_i32_13 = arith.constant 0 : i32
    %30 = arith.cmpi ne, %29, %c0_i32_13 : i32
    scf.if %30 {
      %c0_14 = arith.constant 0 : index
      %31 = memref.load %arg6[%c0_14] : memref<1xf32, #tpu.memory_space<smem>>
      %32 = vector.broadcast %31 : f32 to vector<1x8x128xf32>
      %c0_15 = arith.constant 0 : index
      %c0_16 = arith.constant 0 : index
      %c0_17 = arith.constant 0 : index
      %33 = vector.load %arg5[%c0_15, %c0_16, %c0_17] : memref<1x8x128xf32, #tpu.memory_space<vmem>>, vector<1x8x128xf32>
      tpu.vector_store %arg5[%c0_15, %c0_16, %c0_17], %32 {strides = array<i32>} : memref<1x8x128xf32, #tpu.memory_space<vmem>>, vector<1x8x128xf32>,
    } else {
    }
    return
  }
  func.func @transform_0(%arg0: i32, %arg1: i32) -> (i32, i32) {
    %c1_i32 = arith.constant 1 : i32
    %0 = arith.muli %arg0, %c1_i32 : i32
    %1 = arith.addi %0, %arg1 : i32
    %c0_i32 = arith.constant 0 : i32
    %c0_i32_0 = arith.constant 0 : i32
    return %1, %c0_i32 : i32, i32
  }
  func.func @transform_1(%arg0: i32, %arg1: i32) -> (i32, i32) {
    %c1_i32 = arith.constant 1 : i32
    %0 = arith.muli %arg0, %c1_i32 : i32
    %1 = arith.addi %0, %arg1 : i32
    %c0_i32 = arith.constant 0 : i32
    %c0_i32_0 = arith.constant 0 : i32
    return %1, %c0_i32 : i32, i32
  }
  func.func @transform_2(%arg0: i32, %arg1: i32) -> (i32, i32) {
    %c1_i32 = arith.constant 1 : i32
    %0 = arith.muli %arg0, %c1_i32 : i32
    %1 = arith.addi %0, %arg1 : i32
    %c0_i32 = arith.constant 0 : i32
    %c0_i32_0 = arith.constant 0 : i32
    return %1, %c0_i32 : i32, i32
  }
  func.func @transform_3(%arg0: i32, %arg1: i32) -> (i32, i32, i32) {
    %c0_i32 = arith.constant 0 : i32
    %c0_i32_0 = arith.constant 0 : i32
    %c0_i32_1 = arith.constant 0 : i32
    return %arg0, %c0_i32, %c0_i32_0 : i32, i32, i32
  }
}

</mosaic_0001>

<bundles_post_ra>
// kernel: tpu_custom_call.1
= control target key start
LH: loop header
LB: loop body
LE: loop exit
PB: predicated region body
PF: predicated region fallthrough
CT: control target
= control target key end

     0   :  { %s219_s0 = inlined_call_operand.vmem [shape: f32[2,32], index: 0, kind: input, shape index: {}]   ;;  %s220_s1 = inlined_call_operand.vmem [shape: f32[2,32], index: 1, kind: input, shape index: {}]   ;;  %s221_s2 = inlined_call_operand.vmem [shape: f32[2,1], index: 2, kind: input, shape index: {}]   ;;  %s222_s3 = inlined_call_operand.hbm [shape: f32[1,8,128], index: 3, kind: output, shape index: {}]  }
   0x1   :  { %v72_v0 = vld [vmem:[%s219_s0] sm:$0x3] }
   0x2   :  { %v73_v1 = vld [vmem:[%s220_s1] sm:$0x3] }
   0x3   :  { %v75_v2 = vsub.f32 %v72_v0, %v73_v1 }
   0x4   :  { %8 = vsyncpa [#allocation4], 0  ;;  %vm77_vm0 = vcmask 254976   ;;  %v74_v12 = vld [vmem:[%s221_s2] sm:$0x3]  ;;  %vm96_vm3 = vcmask 1024  }
   0x5   :  { %v76_v3 = vmul.f32 %v75_v2, %v75_v2  ;;  %v91_v14 = vsub.f32 1.0, %v74_v12  ;;  %s177_s1 = smov [#allocation3]  }
   0x6   :  { %s122_s17 = sshll.u32 %s177_s1, 4  ;;  %s123_s17 = int_to_ptr.vmem [resolvable:$true] %s122_s17 }
   0x7   :  { %v78_v4 = vsel %vm77_vm0, %v76_v3, 0.0  ;;  %s153_s18 = scalar_lea.vmem %s123_s17, 128  ;;  %p158_p1 = scmp.lt.s32.totalorder %s123_s17, %s123_s17 }
   0x8   :  { %79 = vadd.xlane.f32.xlu0 %v78_v4  ;;  %p154_p0 = scmp.ne.s32.totalorder %s123_s17, %s153_s18  ;;  %p159_p2 = scmp.lt.s32.totalorder %s153_s18, %s153_s18 }
   0xa   :  { %p160_p3 = por %p159_p2, %p158_p1 }
   0xc   :  { %p161_p4 = pnand %p160_p3, %p154_p0 }
  0x95   :  { %v80_v5 = vpop.xlane.xlu0 %79 }
  0x96   :  { %151 = vrsqrt.f32 %v80_v5  ;;  %vm83_vm1 = vcmp.eq.f32.partialorder %v80_v5, inf  ;;  %v86_v8 = vand.u32 2147483648, %v80_v5  ;;  %vm85_vm2 = vcmp.eq.f32.partialorder %v80_v5, 0.0 }
  0x97   :  { %v88_v16 = vmul.f32 %v80_v5, %v74_v12 }
  0xa0   :  { %v152_v6 = vpop.eup %151 }
  0xa1   :  { %v82_v7 = vmul.f32 %v152_v6, %v80_v5 }
  0xa3   :  { %v84_v9 = vsel %vm83_vm1, %v80_v5, %v82_v7 }
  0xa4   :  { %v87_v10 = vsel %vm85_vm2, %v86_v8, %v84_v9 }
  0xa5   :  { %v89_v11 = vsub.f32 1.0, %v87_v10 }
  0xa7   :  { %v90_v13 = vmax.f32 %v89_v11, 0.0 }
  0xa9   :  { %v92_v15 = vmul.f32 %v90_v13, %v90_v13 }
  0xab   :  { %v93_v17 = vmul.f32 %v92_v15, %v91_v14 }
  0xad   :  { %v94_v18 = vadd.f32 %v93_v17, %v88_v16 }
  0xaf   :  { %v97_v19 = vsel %vm96_vm3, %v94_v18, 0.0 }
  0xb0   :  { %98 = vadd.xlane.f32.xlu0 %v97_v19 }
 0x13d   :  { %v99_v20 = vpop.xlane.xlu0 %98 }
 0x13e   :  { %v100_v21 = vrot.slane %v99_v20, 4 }
 0x140   :  { %v101_v22 = vadd.f32 %v100_v21, %v99_v20 }
 0x142   :  { %v102_v23 = vrot.slane %v101_v22, 2 }
 0x144   :  { %v103_v24 = vadd.f32 %v102_v23, %v101_v22 }
 0x146   :  { %v104_v25 = vrot.slane %v103_v24, 1 }
 0x148   :  { %v105_v26 = vadd.f32 %v104_v25, %v103_v24 }
 0x14a   :  { %148 = vpush %v105_v26 }
 0x17b   :  { %s149_s2 = spop %148 }
 0x17c   :  { %v114_v27 = vstv %s149_s2 }
 0x17d   :  { %115 = vst [vmem:[#allocation3] sm:$0xff] %v114_v27 }
 0x17e   :  { %164 = shalt.err (!%p161_p4)
}
 0x17f   :  { %s165_s21 = scalar_lea.hbm %s222_s3, 128 }
 0x180   :  { %p166_p5 = scmp.ne.s32.totalorder %s222_s3, %s165_s21  ;;  %p169_p6 = scmp.lt.u32.totalorder %s165_s21, %s222_s3 }
 0x182   :  { %p171_p7 = pnand %p169_p6, %p166_p5 }
 0x184   :  { %174 = shalt.err (!%p171_p7)
}
 0x185   :  { %125 = dma.vmem_to_hbm [thread:$0]  %s123_s17, 128, %s222_s3, [#allocation4]  }
 0x186   :  { %175 = dma.done.wait [#allocation4], 128  }
 0x187   :  { %176 = vsyncadd [#allocation4], 4294967168 }
 0x188   :  { %129 = vsyncpa [#allocation4], 1 }

</bundles_post_ra>
